<compile_context>
chip_gen: v5e
topology: v5e:2x2
jax: 0.10.0
libtpu: 0.0.40
codegen_flags: <defaults>
</compile_context>

<pallas_src>
import functools
import math

import jax
import jax.numpy as jnp
from jax import lax
from jax.experimental import pallas as pl
from jax.experimental.pallas import tpu as pltpu

LANE = 128
SUBLANE_F32 = 8


def _round_up(x, m):
    return ((x + m - 1) // m) * m


def _pad_last(x, to):
    pad = to - x.shape[-1]
    if pad == 0:
        return x
    return jnp.pad(x, [(0, 0)] * (x.ndim - 1) + [(0, pad)])


def _tpu_vmem_capacity_bytes():
    try:
        return int(pltpu.get_tpu_info().vmem_capacity_bytes)
    except Exception:
        return 64 * 1024 * 1024        # conservative fallback (v7x-sized VMEM)


def prepare_params(params, encode_dim):
    """One-time parameter preparation, hoisted out of the per-call path.

    - folds the 1/sqrt(encode_dim) softmax scale into Wq / bq (free),
    - zero-pads projection output dims to 128-lane multiples so weight loads
      and the output store are unmasked lane-dense vld/vst (no-op if already
      aligned).
    Weights are expected as (in_dim, out_dim) = PyTorch weight.T.
    """
    wq_t, bq, wk_t, bk, wv_t, bv = params
    E, M = wq_t.shape
    E_out = wv_t.shape[1]
    M_pad = _round_up(M, LANE)
    E_out_pad = _round_up(E_out, LANE)
    scale = 1.0 / math.sqrt(encode_dim)
    return dict(
        wq=_pad_last(wq_t * scale, M_pad),
        bq=_pad_last(bq.reshape(1, -1) * scale, M_pad),
        wk=_pad_last(wk_t, M_pad),
        bk=_pad_last(bk.reshape(1, -1), M_pad),
        wv=_pad_last(wv_t, E_out_pad),
        bv=_pad_last(bv.reshape(1, -1), E_out_pad),
        E=E, M=M, M_pad=M_pad, E_out=E_out, E_out_pad=E_out_pad,
    )


def attention_kernel(pe_ref, be_ref,
                     wq_ref, bq_ref, wk_ref, bk_ref, wv_ref, bv_ref,
                     o_ref, *, sk_real, use_bf16_matmul):
    Bt, Sq, E = pe_ref.shape
    _, Sk, _ = be_ref.shape
    M_pad = wq_ref.shape[1]
    E_out_pad = wv_ref.shape[1]

    mm = jnp.bfloat16 if use_bf16_matmul else jnp.float32

    # (Bt, S, E) -> (Bt*S, E): layout-preserving because the wrapper pads S to
    # sublane multiples.  One big projection matmul per weight instead of Bt
    # tiny ones -> full vregs / MXU rows.
    pe2 = pe_ref[...].reshape(Bt * Sq, E).astype(mm)
    be2 = be_ref[...].reshape(Bt * Sk, E).astype(mm)

    # Projections.  1/sqrt(encode_dim) is pre-folded into wq/bq by
    # prepare_params.  bf16 MXU operands, f32 accumulation; softmax stays f32.
    q = (jnp.dot(pe2, wq_ref[...].astype(mm), preferred_element_type=jnp.float32)
         + bq_ref[...]).reshape(Bt, Sq, M_pad)
    k = (jnp.dot(be2, wk_ref[...].astype(mm), preferred_element_type=jnp.float32)
         + bk_ref[...]).reshape(Bt, Sk, M_pad)
    v = (jnp.dot(be2, wv_ref[...].astype(mm), preferred_element_type=jnp.float32)
         + bv_ref[...]).reshape(Bt, Sk, E_out_pad)

    # Scores: explicit batched last-dim contraction (MXU transposed-RHS path;
    # no materialized / XLU-transposed K).  Padded M lanes of q/k are zero.
    score = lax.dot_general(
        q.astype(mm), k.astype(mm),
        dimension_numbers=(((2,), (2,)), ((0,), (0,))),
        preferred_element_type=jnp.float32)

    if sk_real != Sk:
        # Key rows added by sublane padding carry the Key bias (not zero):
        # mask them out of the softmax.
        key_ids = lax.broadcasted_iota(jnp.int32, score.shape, 2)
        score = jnp.where(key_ids < sk_real, score, -jnp.inf)

    # Numerically stable softmax over keys (f32 on VPU; reciprocal on EUP).
    score = score - jnp.max(score, axis=-1, keepdims=True)
    p = jnp.exp(score)
    p = p * pl.reciprocal(jnp.sum(p, axis=-1, keepdims=True), approx=True)

    out = lax.dot_general(
        p.astype(mm), v.astype(mm),
        dimension_numbers=(((2,), (1,)), ((0,), (0,))),
        preferred_element_type=jnp.float32)
    o_ref[...] = out.astype(o_ref.dtype)


def attention_block(player_encode, bullet_encode, prepped, *,
                    use_bf16_matmul=True, keep_padded_output=False):
    """player_encode: (B, Sq, E), bullet_encode: (B, Sk, E) -> (B, Sq, E_out)."""
    B, Sq, E = player_encode.shape
    Bk, Sk, Ek = bullet_encode.shape
    assert Bk == B and Ek == E and E == prepped["E"]

    M_pad = prepped["M_pad"]
    E_out = prepped["E_out"]
    E_out_pad = prepped["E_out_pad"]

    in_bytes = jnp.dtype(player_encode.dtype).itemsize
    sub = SUBLANE_F32 if in_bytes >= 4 else 2 * SUBLANE_F32

    # Pad sequence dims to sublane multiples so the in-kernel flatten is a
    # layout-preserving reshape (no per-step VMEM copy / cross-sublane shuffle).
    Sq_p = _round_up(Sq, sub)
    Sk_p = _round_up(Sk, sub)
    if Sq_p != Sq:
        player_encode = jnp.pad(player_encode, ((0, 0), (0, Sq_p - Sq), (0, 0)))
    if Sk_p != Sk:
        bullet_encode = jnp.pad(bullet_encode, ((0, 0), (0, Sk_p - Sk), (0, 0)))

    # ---- generation-aware batch-tile selection ------------------------------
    vmem_cap = _tpu_vmem_capacity_bytes()
    is_v7x_like = vmem_cap <= 64 * 1024 * 1024        # 64 MiB VMEM <=> 2 TCs
    mm_bytes = 2 if use_bf16_matmul else 4

    # Resident (grid-invariant) weights/biases: f32 copy + per-step bf16 copy.
    w_elems = E * M_pad * 2 + E * E_out_pad + 2 * M_pad + E_out_pad
    w_bytes = w_elems * (4 + mm_bytes)

    # Per-batch-element VMEM: double-buffered in/out tiles + bf16 input copies
    # + q/k/v (f32 + matmul-operand copies) + f32 score/probs (+ bf16 probs)
    # + f32 output accumulator.
    bytes_per_batch = (
        2 * (Sq_p * E + Sk_p * E) * in_bytes            # pipelined input tiles
        + 2 * Sq_p * E_out_pad * in_bytes               # pipelined output tiles
        + (Sq_p * E + Sk_p * E) * mm_bytes              # bf16 input copies
        + (Sq_p + Sk_p) * M_pad * (4 + mm_bytes)        # q, k
        + Sk_p * E_out_pad * (4 + mm_bytes)             # v
        + Sq_p * Sk_p * (8 + mm_bytes)                  # score, probs
        + Sq_p * E_out_pad * 4)                         # output accumulator

    # ~24 MiB of tile state on a 64 MiB part (v7x), ~48 MiB on 128 MiB parts.
    budget = max(vmem_cap * 3 // 8 - w_bytes, bytes_per_batch)
    bt = max(1, min(B, budget // bytes_per_batch))
    if is_v7x_like and B >= 16 and bt > pl.cdiv(B, 2):
        bt = pl.cdiv(B, 2)          # give both v7x TensorCores a grid step
    nb = pl.cdiv(B, bt)             # no divisibility collapse: pad B instead
    B_p = nb * bt
    if B_p != B:
        player_encode = jnp.pad(player_encode, ((0, B_p - B), (0, 0), (0, 0)))
        bullet_encode = jnp.pad(bullet_encode, ((0, B_p - B), (0, 0), (0, 0)))

    # Explicit scoped-VMEM limit covering the chosen tile + resident weights
    # (default is only 16/32 MiB and would reject the near-VMEM-max tile).
    vmem_limit = int(min(vmem_cap * 3 // 4,
                         max(bt * bytes_per_batch + 2 * w_bytes + (8 << 20),
                             32 << 20)))

    kernel = functools.partial(attention_kernel,
                               sk_real=Sk, use_bf16_matmul=use_bf16_matmul)

    # Grid-invariant operands: whole-array resident VMEM copy (single buffer —
    # the block index never changes, so no double-buffer VMEM cost).
    vmem_full = pl.BlockSpec(memory_space=pltpu.MemorySpace.VMEM)

    out_padded = pl.pallas_call(
        kernel,
        out_shape=jax.ShapeDtypeStruct((B_p, Sq_p, E_out_pad),
                                       player_encode.dtype),
        grid=(nb,),
        in_specs=[
            pl.BlockSpec((bt, Sq_p, E), lambda b: (b, 0, 0)),   # player_encode
            pl.BlockSpec((bt, Sk_p, E), lambda b: (b, 0, 0)),   # bullet_encode
            vmem_full,                                          # Wq^T (scaled, padded)
            vmem_full,                                          # bq
            vmem_full,                                          # Wk^T
            vmem_full,                                          # bk
            vmem_full,                                          # Wv^T
            vmem_full,                                          # bv
        ],
        out_specs=pl.BlockSpec((bt, Sq_p, E_out_pad), lambda b: (b, 0, 0)),
        compiler_params=pltpu.CompilerParams(
            dimension_semantics=("parallel",),
            vmem_limit_bytes=vmem_limit),
    )(player_encode, bullet_encode,
      prepped["wq"], prepped["bq"], prepped["wk"], prepped["bk"],
      prepped["wv"], prepped["bv"])

    out = out_padded
    if B_p != B or Sq_p != Sq:
        out = out[:B, :Sq]
    if E_out_pad != E_out and not keep_padded_output:
        out = out[..., :E_out]      # only when the value dim isn't lane-aligned
    return out


def init_params(key, encode_dim, model_dim):
    """Deterministic init mimicking nn.Linear default (U[-1/sqrt(in), 1/sqrt(in)])."""
    ks = jax.random.split(key, 6)
    bound = 1.0 / math.sqrt(encode_dim)
    # Stored directly as (in, out) == weight.T for the kernel.
    wq_t = jax.random.uniform(ks[0], (encode_dim, model_dim), jnp.float32, -bound, bound)
    bq = jax.random.uniform(ks[1], (1, model_dim), jnp.float32, -bound, bound)
    wk_t = jax.random.uniform(ks[2], (encode_dim, model_dim), jnp.float32, -bound, bound)
    bk = jax.random.uniform(ks[3], (1, model_dim), jnp.float32, -bound, bound)
    wv_t = jax.random.uniform(ks[4], (encode_dim, encode_dim), jnp.float32, -bound, bound)
    bv = jax.random.uniform(ks[5], (1, encode_dim), jnp.float32, -bound, bound)
    return (wq_t, bq, wk_t, bk, wv_t, bv)


def reference(player_encode, bullet_encode, params, encode_dim):
    wq_t, bq, wk_t, bk, wv_t, bv = params
    q = player_encode @ wq_t + bq
    k = bullet_encode @ wk_t + bk
    v = bullet_encode @ wv_t + bv
    score = q @ jnp.swapaxes(k, -2, -1) / math.sqrt(encode_dim)
    score = jax.nn.softmax(score, axis=-1)
    return score @ v


if __name__ == "__main__":
    B, Sq, Sk = 2, 8, 8
    encode_dim, model_dim = 32, 16

    key = jax.random.PRNGKey(0)
    k1, k2, k3 = jax.random.split(key, 3)
    player_encode = jax.random.normal(k1, (B, Sq, encode_dim), jnp.float32)
    bullet_encode = jax.random.normal(k2, (B, Sk, encode_dim), jnp.float32)
    params = init_params(k3, encode_dim, model_dim)

    # One-time parameter preparation (scale fold + lane padding), hoisted out
    # of the per-call path.
    prepped = prepare_params(params, encode_dim)

    out = attention_block(player_encode, bullet_encode, prepped)
    out = jax.block_until_ready(out)

    ref = reference(player_encode, bullet_encode, params, encode_dim)
    assert out.shape == (B, Sq, encode_dim)
    # bf16 MXU operands (with f32 accumulation / f32 softmax) + EUP approx
    # reciprocal -> compare against the exact f32 reference at bf16-scale
    # tolerance.  Consumers needing exact normalization should pass
    # use_bf16_matmul=False and switch to an exact divide.
    err = float(jnp.max(jnp.abs(out - ref)))
    assert jnp.allclose(out, ref, atol=2e-2, rtol=2e-2), f"max abs err {err}"

    print("KERNEL_OK")
</pallas_src>

<mosaic_0001>
module attributes {stable_mosaic.version = 11 : i64} {
  func.func @attention_kernel(%arg0: i32, %arg1: memref<2x8x32xf32, #tpu.memory_space<vmem>>, %arg2: memref<2x8x32xf32, #tpu.memory_space<vmem>>, %arg3: memref<32x128xf32, #tpu.memory_space<vmem>>, %arg4: memref<1x128xf32, #tpu.memory_space<vmem>>, %arg5: memref<32x128xf32, #tpu.memory_space<vmem>>, %arg6: memref<1x128xf32, #tpu.memory_space<vmem>>, %arg7: memref<32x128xf32, #tpu.memory_space<vmem>>, %arg8: memref<1x128xf32, #tpu.memory_space<vmem>>, %arg9: memref<2x8x128xf32, #tpu.memory_space<vmem>>) attributes {dimension_semantics = [#tpu.dimension_semantics<parallel>], iteration_bounds = array<i64: 1>, scalar_prefetch = 0 : i64, scratch_operands = 0 : i64, tpu.core_type = #tpu.core_type<tc>, window_params = [{transform_indices = @transform_0, window_bounds = array<i64: 2, 8, 32>}, {transform_indices = @transform_1, window_bounds = array<i64: 2, 8, 32>}, {pipeline_mode = #tpu.pipeline_mode<synchronous>, transform_indices = @transform_2, window_bounds = array<i64: 32, 128>}, {pipeline_mode = #tpu.pipeline_mode<synchronous>, transform_indices = @transform_3, window_bounds = array<i64: 1, 128>}, {pipeline_mode = #tpu.pipeline_mode<synchronous>, transform_indices = @transform_4, window_bounds = array<i64: 32, 128>}, {pipeline_mode = #tpu.pipeline_mode<synchronous>, transform_indices = @transform_5, window_bounds = array<i64: 1, 128>}, {pipeline_mode = #tpu.pipeline_mode<synchronous>, transform_indices = @transform_6, window_bounds = array<i64: 32, 128>}, {pipeline_mode = #tpu.pipeline_mode<synchronous>, transform_indices = @transform_7, window_bounds = array<i64: 1, 128>}, {transform_indices = @transform_8, window_bounds = array<i64: 2, 8, 128>}]} {
    %c0 = arith.constant 0 : index
    %c0_0 = arith.constant 0 : index
    %c0_1 = arith.constant 0 : index
    %0 = vector.load %arg1[%c0, %c0_0, %c0_1] : memref<2x8x32xf32, #tpu.memory_space<vmem>>, vector<2x8x32xf32>
    %1 = vector.shape_cast %0 : vector<2x8x32xf32> to vector<16x32xf32>
    %2 = arith.truncf %1 : vector<16x32xf32> to vector<16x32xbf16>
    %c0_2 = arith.constant 0 : index
    %c0_3 = arith.constant 0 : index
    %c0_4 = arith.constant 0 : index
    %3 = vector.load %arg2[%c0_2, %c0_3, %c0_4] : memref<2x8x32xf32, #tpu.memory_space<vmem>>, vector<2x8x32xf32>
    %4 = vector.shape_cast %3 : vector<2x8x32xf32> to vector<16x32xf32>
    %5 = arith.truncf %4 : vector<16x32xf32> to vector<16x32xbf16>
    %c0_5 = arith.constant 0 : index
    %c0_6 = arith.constant 0 : index
    %6 = vector.load %arg3[%c0_5, %c0_6] : memref<32x128xf32, #tpu.memory_space<vmem>>, vector<32x128xf32>
    %7 = arith.truncf %6 : vector<32x128xf32> to vector<32x128xbf16>
    %cst = arith.constant dense<0.000000e+00> : vector<16x128xf32>
    %8 = tpu.matmul %2, %7, %cst {dimension_numbers = #tpu.dot_dimension_numbers<[1], [0], [0], [1], [0, 0, 1, 1], [], []>} : vector<16x32xbf16>, vector<32x128xbf16>, vector<16x128xf32> -> vector<16x128xf32>
    %c0_7 = arith.constant 0 : index
    %c0_8 = arith.constant 0 : index
    %9 = vector.load %arg4[%c0_7, %c0_8] : memref<1x128xf32, #tpu.memory_space<vmem>>, vector<1x128xf32>
    %10 = vector.broadcast %9 : vector<1x128xf32> to vector<16x128xf32>
    %11 = arith.addf %8, %10 : vector<16x128xf32>
    %12 = vector.shape_cast %11 : vector<16x128xf32> to vector<2x8x128xf32>
    %c0_9 = arith.constant 0 : index
    %c0_10 = arith.constant 0 : index
    %13 = vector.load %arg5[%c0_9, %c0_10] : memref<32x128xf32, #tpu.memory_space<vmem>>, vector<32x128xf32>
    %14 = arith.truncf %13 : vector<32x128xf32> to vector<32x128xbf16>
    %cst_11 = arith.constant dense<0.000000e+00> : vector<16x128xf32>
    %15 = tpu.matmul %5, %14, %cst_11 {dimension_numbers = #tpu.dot_dimension_numbers<[1], [0], [0], [1], [0, 0, 1, 1], [], []>} : vector<16x32xbf16>, vector<32x128xbf16>, vector<16x128xf32> -> vector<16x128xf32>
    %c0_12 = arith.constant 0 : index
    %c0_13 = arith.constant 0 : index
    %16 = vector.load %arg6[%c0_12, %c0_13] : memref<1x128xf32, #tpu.memory_space<vmem>>, vector<1x128xf32>
    %17 = vector.broadcast %16 : vector<1x128xf32> to vector<16x128xf32>
    %18 = arith.addf %15, %17 : vector<16x128xf32>
    %19 = vector.shape_cast %18 : vector<16x128xf32> to vector<2x8x128xf32>
    %c0_14 = arith.constant 0 : index
    %c0_15 = arith.constant 0 : index
    %20 = vector.load %arg7[%c0_14, %c0_15] : memref<32x128xf32, #tpu.memory_space<vmem>>, vector<32x128xf32>
    %21 = arith.truncf %20 : vector<32x128xf32> to vector<32x128xbf16>
    %cst_16 = arith.constant dense<0.000000e+00> : vector<16x128xf32>
    %22 = tpu.matmul %5, %21, %cst_16 {dimension_numbers = #tpu.dot_dimension_numbers<[1], [0], [0], [1], [0, 0, 1, 1], [], []>} : vector<16x32xbf16>, vector<32x128xbf16>, vector<16x128xf32> -> vector<16x128xf32>
    %c0_17 = arith.constant 0 : index
    %c0_18 = arith.constant 0 : index
    %23 = vector.load %arg8[%c0_17, %c0_18] : memref<1x128xf32, #tpu.memory_space<vmem>>, vector<1x128xf32>
    %24 = vector.broadcast %23 : vector<1x128xf32> to vector<16x128xf32>
    %25 = arith.addf %22, %24 : vector<16x128xf32>
    %26 = vector.shape_cast %25 : vector<16x128xf32> to vector<2x8x128xf32>
    %27 = arith.truncf %12 : vector<2x8x128xf32> to vector<2x8x128xbf16>
    %28 = arith.truncf %19 : vector<2x8x128xf32> to vector<2x8x128xbf16>
    %cst_19 = arith.constant dense<0.000000e+00> : vector<2x8x8xf32>
    %29 = tpu.matmul %27, %28, %cst_19 {dimension_numbers = #tpu.dot_dimension_numbers<[2], [2], [1], [1], [0, 0, 0, 1, 1, 1], [0], [0]>} : vector<2x8x128xbf16>, vector<2x8x128xbf16>, vector<2x8x8xf32> -> vector<2x8x8xf32>
    %cst_20 = arith.constant dense<0xFF800000> : vector<2x8xf32>
    %30 = vector.multi_reduction <maximumf>, %29, %cst_20 [2] : vector<2x8x8xf32> to vector<2x8xf32>
    %31 = vector.shape_cast %30 : vector<2x8xf32> to vector<2x8x1xf32>
    %32 = vector.broadcast %31 : vector<2x8x1xf32> to vector<2x8x8xf32>
    %33 = arith.subf %29, %32 : vector<2x8x8xf32>
    %34 = math.exp %33 : vector<2x8x8xf32>
    %cst_21 = arith.constant dense<0.000000e+00> : vector<2x8xf32>
    %35 = vector.multi_reduction <add>, %34, %cst_21 [2] : vector<2x8x8xf32> to vector<2x8xf32>
    %36 = vector.shape_cast %35 : vector<2x8xf32> to vector<2x8x1xf32>
    %37 = tpu.reciprocal %36 {approx = true} : vector<2x8x1xf32> -> vector<2x8x1xf32>
    %38 = vector.broadcast %37 : vector<2x8x1xf32> to vector<2x8x8xf32>
    %39 = arith.mulf %34, %38 : vector<2x8x8xf32>
    %40 = arith.truncf %39 : vector<2x8x8xf32> to vector<2x8x8xbf16>
    %41 = arith.truncf %26 : vector<2x8x128xf32> to vector<2x8x128xbf16>
    %cst_22 = arith.constant dense<0.000000e+00> : vector<2x8x128xf32>
    %42 = tpu.matmul %40, %41, %cst_22 {dimension_numbers = #tpu.dot_dimension_numbers<[2], [1], [1], [2], [0, 0, 0, 1, 1, 2], [0], [0]>} : vector<2x8x8xbf16>, vector<2x8x128xbf16>, vector<2x8x128xf32> -> vector<2x8x128xf32>
    %c0_23 = arith.constant 0 : index
    %c0_24 = arith.constant 0 : index
    %c0_25 = arith.constant 0 : index
    %43 = vector.load %arg9[%c0_23, %c0_24, %c0_25] : memref<2x8x128xf32, #tpu.memory_space<vmem>>, vector<2x8x128xf32>
    tpu.vector_store %arg9[%c0_23, %c0_24, %c0_25], %42 {strides = array<i32>} : memref<2x8x128xf32, #tpu.memory_space<vmem>>, vector<2x8x128xf32>,
    return
  }
  func.func @transform_0(%arg0: i32) -> (i32, i32, i32) {
    %c0_i32 = arith.constant 0 : i32
    %c0_i32_0 = arith.constant 0 : i32
    %c0_i32_1 = arith.constant 0 : i32
    return %arg0, %c0_i32, %c0_i32_0 : i32, i32, i32
  }
  func.func @transform_1(%arg0: i32) -> (i32, i32, i32) {
    %c0_i32 = arith.constant 0 : i32
    %c0_i32_0 = arith.constant 0 : i32
    %c0_i32_1 = arith.constant 0 : i32
    return %arg0, %c0_i32, %c0_i32_0 : i32, i32, i32
  }
  func.func @transform_2(%arg0: i32) -> (i32, i32) {
    %c0_i32 = arith.constant 0 : i32
    %c0_i32_0 = arith.constant 0 : i32
    %c0_i32_1 = arith.constant 0 : i32
    return %c0_i32, %c0_i32_0 : i32, i32
  }
  func.func @transform_3(%arg0: i32) -> (i32, i32) {
    %c0_i32 = arith.constant 0 : i32
    %c0_i32_0 = arith.constant 0 : i32
    %c0_i32_1 = arith.constant 0 : i32
    return %c0_i32, %c0_i32_0 : i32, i32
  }
  func.func @transform_4(%arg0: i32) -> (i32, i32) {
    %c0_i32 = arith.constant 0 : i32
    %c0_i32_0 = arith.constant 0 : i32
    %c0_i32_1 = arith.constant 0 : i32
    return %c0_i32, %c0_i32_0 : i32, i32
  }
  func.func @transform_5(%arg0: i32) -> (i32, i32) {
    %c0_i32 = arith.constant 0 : i32
    %c0_i32_0 = arith.constant 0 : i32
    %c0_i32_1 = arith.constant 0 : i32
    return %c0_i32, %c0_i32_0 : i32, i32
  }
  func.func @transform_6(%arg0: i32) -> (i32, i32) {
    %c0_i32 = arith.constant 0 : i32
    %c0_i32_0 = arith.constant 0 : i32
    %c0_i32_1 = arith.constant 0 : i32
    return %c0_i32, %c0_i32_0 : i32, i32
  }
  func.func @transform_7(%arg0: i32) -> (i32, i32) {
    %c0_i32 = arith.constant 0 : i32
    %c0_i32_0 = arith.constant 0 : i32
    %c0_i32_1 = arith.constant 0 : i32
    return %c0_i32, %c0_i32_0 : i32, i32
  }
  func.func @transform_8(%arg0: i32) -> (i32, i32, i32) {
    %c0_i32 = arith.constant 0 : i32
    %c0_i32_0 = arith.constant 0 : i32
    %c0_i32_1 = arith.constant 0 : i32
    return %arg0, %c0_i32, %c0_i32_0 : i32, i32, i32
  }
}

</mosaic_0001>

<bundles_post_ra>
// kernel: tpu_custom_call.1
= control target key start
LH: loop header
LB: loop body
LE: loop exit
PB: predicated region body
PF: predicated region fallthrough
CT: control target
= control target key end

     0   :  { %13 = vsyncpa [#allocation3], 0  ;;  %s596_s0 = inlined_call_operand.hbm [shape: f32[2,8,32], index: 0, kind: input, shape index: {}]   ;;  %s597_s1 = inlined_call_operand.hbm [shape: f32[2,8,32], index: 1, kind: input, shape index: {}]   ;;  %s598_s2 = inlined_call_operand.hbm [shape: f32[32,128], index: 2, kind: input, shape index: {}]   ;;  %s599_s3 = inlined_call_operand.vmem [shape: f32[1,128], index: 3, kind: input, shape index: {}]   ;;  %s600_s4 = inlined_call_operand.hbm [shape: f32[32,128], index: 4, kind: input, shape index: {}]   ;;  %s601_s5 = inlined_call_operand.vmem [shape: f32[1,128], index: 5, kind: input, shape index: {}]   ;;  %s602_s6 = inlined_call_operand.hbm [shape: f32[32,128], index: 6, kind: input, shape index: {}]   ;;  %s603_s7 = inlined_call_operand.vmem [shape: f32[1,128], index: 7, kind: input, shape index: {}]   ;;  %s604_s8 = inlined_call_operand.hbm [shape: f32[2,8,128], index: 8, kind: output, shape index: {}]  }
   0x1   :  { %14 = vsyncpa [#allocation6], 0 }
   0x2   :  { %15 = vsyncpa [#allocation9], 0 }
   0x3   :  { %16 = vsyncpa [#allocation4], 0  ;;  %s34_s29 = sshll.u32 %s597_s1, 4  ;;  %s489_s30 = smov [#allocation5]   ;;  %s35_s29 = int_to_ptr.hbm [resolvable:$true] %s34_s29 }
   0x4   :  { %s36_s9 = sshll.u32 %s489_s30, 4  ;;  %s62_s12 = sshll.u32 %s600_s4, 4  ;;  %s37_s9 = int_to_ptr.vmem [resolvable:$true] %s36_s9  ;;  %s63_s12 = int_to_ptr.hbm [resolvable:$true] %s62_s12 }
   0x5   :  { %s490_s13 = smov 128   ;;  %s491_s14 = smov 8  }
   0x6   :  { %42 = dma.hbm_to_vmem [thread:$0]  %s35_s29, 256, %s37_s9, [#allocation6], %s490_s13, %s490_s13, %s491_s14  }
   0x7   :  { %s492_s15 = smov [#allocation8]   ;;  %s21_s1 = sshll.u32 %s596_s0, 4  ;;  %s22_s1 = int_to_ptr.hbm [resolvable:$true] %s21_s1 }
   0x8   :  { %s64_s16 = sshll.u32 %s492_s15, 4  ;;  %s47_s20 = sshll.u32 %s598_s2, 4  ;;  %s65_s16 = int_to_ptr.vmem [resolvable:$true] %s64_s16  ;;  %s48_s20 = int_to_ptr.hbm [resolvable:$true] %s47_s20 }
   0x9   :  { %70 = dma.hbm_to_vmem [thread:$0]  %s63_s12, 512, %s65_s16, [#allocation9], %s490_s13, %s490_s13, %s491_s14  }
   0xa   :  { %s493_s21 = smov [#allocation2]   ;;  %s494_s23 = smov [#allocation7]  }
   0xb   :  { %s23_s22 = sshll.u32 %s493_s21, 4  ;;  %s49_s0 = sshll.u32 %s494_s23, 4  ;;  %s24_s22 = int_to_ptr.vmem [resolvable:$true] %s23_s22  ;;  %s50_s0 = int_to_ptr.vmem [resolvable:$true] %s49_s0 }
   0xc   :  { %29 = dma.hbm_to_vmem [thread:$0]  %s22_s1, 256, %s24_s22, [#allocation3], %s490_s13, %s490_s13, %s491_s14  }
   0xd   :  { %s77_s26 = sshll.u32 %s602_s6, 4  ;;  %s495_s2 = smov [#allocation10]   ;;  %s78_s26 = int_to_ptr.hbm [resolvable:$true] %s77_s26 }
   0xe   :  { %55 = dma.hbm_to_vmem [thread:$0]  %s48_s20, 512, %s50_s0, [#allocation6], %s490_s13, %s490_s13, %s491_s14  }
   0xf   :  { %s79_s27 = sshll.u32 %s495_s2, 4  ;;  %s80_s27 = int_to_ptr.vmem [resolvable:$true] %s79_s27 }
  0x10   :  { %85 = dma.hbm_to_vmem [thread:$0]  %s78_s26, 512, %s80_s27, [#allocation9], %s490_s13, %s490_s13, %s491_s14  }
  0x11   :  { %481 = dma.done.wait [#allocation3], 256  }
  0x12   :  { %482 = vsyncadd [#allocation3], 4294967040 }
  0x13   :  { %483 = dma.done.wait [#allocation6], 768  }
  0x14   :  { %484 = vsyncadd [#allocation6], 4294966528 }
  0x15   :  { %485 = dma.done.wait [#allocation9], 1024  }
  0x16   :  { %486 = vsyncadd [#allocation9], 4294966272  ;;  %v145_v0 = vld [vmem:[#allocation8 + $0x10] sm:$0xff]  ;;  %v146_v1 = vld [vmem:[#allocation8 + $0x18] sm:$0xff]  ;;  %vm125_vm0 = vcmask 261120   ;;  %vm224_vm1 = vcmask 64512  }
  0x17   :  { %v143_v2 = vld [vmem:[#allocation8] sm:$0xff]  ;;  %v148_v3 = vpack.c.bf16 %v146_v1, %v145_v0  ;;  %v144_v4 = vld [vmem:[#allocation8 + $0x8] sm:$0xff]  ;;  %v117_v5 = vld [vmem:[#allocation7 + $0x10] sm:$0xff]  ;;  %vm254_vm2 = vcmask 1043456   ;;  %s298_s12 = sshll.u32 %s604_s8, 4  ;;  %s299_s12 = int_to_ptr.hbm [resolvable:$true] %s298_s12 }
  0x18   :  { %v118_v6 = vld [vmem:[#allocation7 + $0x18] sm:$0xff]  ;;  %v112_v8 = vld [vmem:[#allocation5] sm:$0xff]  ;;  %v115_v10 = vld [vmem:[#allocation7] sm:$0xff]  ;;  %v147_v11 = vpack.c.bf16 %v144_v4, %v143_v2 }
  0x19   :  { %v120_v7 = vpack.c.bf16 %v118_v6, %v117_v5  ;;  %v113_v9 = vld [vmem:[#allocation5 + $0x8] sm:$0xff]  ;;  %162 = vmatpush.bf16.msra.mxu1 %v148_v3  ;;  %v116_v12 = vld [vmem:[#allocation7 + $0x8] sm:$0xff]  ;;  %v109_v13 = vld [vmem:[#allocation2] sm:$0xff] }
  0x1a   :  { %v110_v14 = vld [vmem:[#allocation2 + $0x8] sm:$0xff]  ;;  %v119_v15 = vpack.c.bf16 %v116_v12, %v115_v10  ;;  %v114_v16 = vpack.c.bf16 %v113_v9, %v112_v8  ;;  %v326_v18 = vld [vmem:[%s601_s5] ss:$0 sm:$0xff]  ;;  %v172_v32 = vld [vmem:[#allocation10 + $0x10] sm:$0xff] }
  0x1b   :  { %135 = vmatpush.bf16.msra.mxu0 %v120_v7  ;;  %v111_v17 = vpack.c.bf16 %v110_v14, %v109_v13  ;;  %v327_v20 = vld [vmem:[%s599_s3] ss:$0 sm:$0xff]  ;;  %v173_v33 = vld [vmem:[#allocation10 + $0x18] sm:$0xff]  ;;  %v171_v36 = vld [vmem:[#allocation10 + $0x8] sm:$0xff] }
  0x1c   :  { %v170_v34 = vld [vmem:[#allocation10] sm:$0xff]  ;;  %v175_v35 = vpack.c.bf16 %v173_v33, %v172_v32 }
  0x1d   :  { %163 = vmatpush.bf16.msra.mxu1 %v147_v11  ;;  %v174_v37 = vpack.c.bf16 %v171_v36, %v170_v34  ;;  %v328_v44 = vld [vmem:[%s603_s7] ss:$0 sm:$0xff]  ;;  %s496_s7 = smov [#allocation11]  }
  0x1e   :  { %186 = vmatpush.bf16.msra.mxu2 %v175_v35  ;;  %s296_s9 = sshll.u32 %s496_s7, 4  ;;  %s297_s9 = int_to_ptr.vmem [resolvable:$true] %s296_s9 }
  0x1f   :  { %136 = vmatpush.bf16.msra.mxu0 %v119_v15 }
  0x20   :  { %314 = vmatmul.msk.bf16.vlgmr.msra.gmra.mxu1 %vm125_vm0, %v114_v16 }
  0x22   :  { %313 = vmatmul.msk.bf16.vlgmr.msra.gmra.mxu0 %vm125_vm0, %v111_v17  ;;  %187 = vmatpush.bf16.msra.mxu2 %v174_v37 }
  0x25   :  { %315 = vmatmul.msk.bf16.vlgmr.msra.gmra.mxu2 %vm125_vm0, %v114_v16 }
  0x9d   :  { %v165_v19 = vpop.f32.mrf.mxu1 }
  0x9e   :  { %v166_v21 = vadd.f32 %v326_v18, %v165_v19 }
  0x9f   :  { %v138_v22 = vpop.f32.mrf.mxu0 }
  0xa0   :  { %v196_v23 = vpack.c.bf16 %v166_v21, %v166_v21  ;;  %v139_v24 = vadd.f32 %v327_v20, %v138_v22 }
  0xa2   :  { %205 = vmatpush.bf16.xpose.msra.mxu3 %v196_v23  ;;  %v194_v25 = vpack.c.bf16 %v139_v24, %v139_v24 }
  0xa5   :  { %v167_v26 = vpop.f32.mrf.mxu1 }
  0xa6   :  { %v168_v27 = vadd.f32 %v326_v18, %v167_v26 }
  0xa7   :  { %v140_v29 = vpop.f32.mrf.mxu0 }
  0xa8   :  { %v197_v28 = vpack.c.bf16 %v168_v27, %v168_v27  ;;  %v141_v30 = vadd.f32 %v327_v20, %v140_v29  ;;  %v189_v47 = vpop.f32.mrf.mxu2 }
  0xa9   :  { %206 = vmatmul.bf16.vlgmr.msra.gmra.mxu3 %v194_v25  ;;  %v190_v49 = vadd.f32 %v328_v44, %v189_v47 }
  0xaa   :  { %218 = vmatpush.bf16.xpose.msrb.mxu0 %v197_v28  ;;  %v195_v31 = vpack.c.bf16 %v141_v30, %v141_v30 }
  0xab   :  { %v249_v50 = vpack.c.bf16 %v190_v49, %v190_v49 }
  0xad   :  { %v256_v51 = vsel %vm254_vm2, %v249_v50, 0 }
  0xae   :  { %265 = vmatpush.bf16.msrb.mxu1 %v256_v51 }
  0xb0   :  { %v191_v54 = vpop.f32.mrf.mxu2 }
  0xb1   :  { %219 = vmatmul.bf16.vlgmr.msrb.gmra.mxu0 %v195_v31  ;;  %v192_v57 = vadd.f32 %v328_v44, %v191_v54 }
  0xb3   :  { %v250_v59 = vpack.c.bf16 %v192_v57, %v192_v57 }
  0xb5   :  { %v275_v60 = vsel %vm254_vm2, %v250_v59, 0 }
  0xb6   :  { %284 = vmatpush.bf16.msrb.mxu2 %v275_v60 }
 0x12c   :  { %v207_v38 = vpop.f32.mrf.mxu3 }
 0x12d   :  { %v225_v43 = vsel %vm224_vm1, %v207_v38, -inf }
 0x12e   :  { %v220_v39 = vpop.f32.mrf.mxu0 }
 0x12f   :  { %v228_v40 = vsel %vm224_vm1, %v220_v39, -inf }
 0x130   :  { %229 = vmax.xlane.f32.xlu0 %v228_v40 }
 0x134   :  { %v209_v41 = vpop.f32.mrf.mxu3 }
 0x136   :  { %v222_v42 = vpop.f32.mrf.mxu0 }
 0x138   :  { %226 = vmax.xlane.f32.xlu0 %v225_v43 }
 0x1a3   :  { %v230_v45 = vpop.xlane.xlu0 %229 }
 0x1a4   :  { %v232_v46 = vsub.f32 %v220_v39, %v230_v45 }
 0x1a6   :  { %v235_v48 = vmul.f32 1.442695, %v232_v46 }
 0x1a8   :  { %329 = vpow2.f32 %v235_v48 }
 0x1ab   :  { %v227_v52 = vpop.xlane.xlu0 %226 }
 0x1ac   :  { %v231_v53 = vsub.f32 %v207_v38, %v227_v52 }
 0x1ae   :  { %v330_v55 = vpop.eup %329  ;;  %v233_v56 = vmul.f32 1.442695, %v231_v53 }
 0x1af   :  { %v240_v58 = vsel %vm224_vm1, %v330_v55, 0.0 }
 0x1b0   :  { %331 = vpow2.f32 %v233_v56  ;;  %241 = vadd.xlane.f32.xlu1 %v240_v58 }
 0x1b6   :  { %v332_v61 = vpop.eup %331 }
 0x1b7   :  { %v237_v62 = vsel %vm224_vm1, %v332_v61, 0.0 }
 0x1b8   :  { %238 = vadd.xlane.f32.xlu1 %v237_v62 }
 0x223   :  { %v242_v63 = vpop.xlane.xlu1 %241 }
 0x224   :  { %333 = vrcp.f32 %v242_v63 }
 0x22a   :  { %v334_v0 = vpop.eup %333 }
 0x22b   :  { %v246_v1 = vmul.f32 %v334_v0, %v330_v55  ;;  %v239_v2 = vpop.xlane.xlu1 %238 }
 0x22c   :  { %335 = vrcp.f32 %v239_v2 }
 0x22d   :  { %v248_v3 = vpack.c.bf16 %v246_v1, %v246_v1 }
 0x22f   :  { %317 = vmatmul.msk.bf16.vlgmr.msrb.gmra.mxu2 %vm224_vm1, %v248_v3 }
 0x232   :  { %v336_v4 = vpop.eup %335 }
 0x233   :  { %v245_v5 = vmul.f32 %v336_v4, %v332_v61 }
 0x235   :  { %v247_v6 = vpack.c.bf16 %v245_v5, %v245_v5 }
 0x237   :  { %316 = vmatmul.msk.bf16.vlgmr.msrb.gmra.mxu1 %vm224_vm1, %v247_v6 }
 0x2b2   :  { %v286_v7 = vpop.f32.mrf.mxu2 }
 0x2b3   :  { %291 = vst [vmem:[#allocation11 + $0x8] sm:$0xff] %v286_v7 }
 0x2b4   :  { %v267_v8 = vpop.f32.mrf.mxu1 }
 0x2b5   :  { %290 = vst [vmem:[#allocation11] sm:$0xff] %v267_v8 }
 0x2b6   :  { %304 = dma.vmem_to_hbm [thread:$0]  %s297_s9, 256, %s299_s12, [#allocation4], %s490_s13, %s490_s13, %s491_s14  }
 0x2ba   :  { %v288_v9 = vpop.f32.mrf.mxu2 }
 0x2bc   :  { %v269_v10 = vpop.f32.mrf.mxu1 }
 0x2bd   :  { %487 = dma.done.wait [#allocation4], 256  }
 0x2be   :  { %488 = vsyncadd [#allocation4], 4294967040 }
 0x2bf   :  { %309 = vsyncpa [#allocation3], 1 }
 0x2c0   :  { %310 = vsyncpa [#allocation6], 1 }
 0x2c1   :  { %311 = vsyncpa [#allocation9], 1 }
 0x2c2   :  { %312 = vsyncpa [#allocation4], 1 }

</bundles_post_ra>
